<compile_context>
chip_gen: v7x
topology: tpu7x:2x2x1
jax: 0.10.0
libtpu: 0.0.40
codegen_flags: <defaults>
</compile_context>

<pallas_src>
import functools

import numpy as np
import jax
import jax.numpy as jnp
from jax import lax
from jax.experimental import pallas as pl
from jax.experimental.pallas import tpu as pltpu

DROP_P = 0.25
_DROP_THRESH = int(round(DROP_P * (1 << 32)))   # keep if bits >= thresh (python int)
_KEEP_SCALE = float(1.0 / (1.0 - DROP_P))       # python float
_SALT1 = 0x9E3779B9                             # per-layer salts (python ints)
_SALT2 = 0x3C6EF372


def _round_up(a, b):
    return (a + b - 1) // b * b


def _lowbias32(x):
    """Single lowbias32 mixing round -- pure u32 VPU ops, np-scalar constants only."""
    x = x ^ (x >> 16)
    x = x * np.uint32(0x7FEB352D)
    x = x ^ (x >> 15)
    x = x * np.uint32(0x846CA68B)
    x = x ^ (x >> 16)
    return x


def _relu_dropout(h, bits):
    """Fused ReLU + training-mode dropout via integer threshold (f32 math)."""
    keep = (bits >= np.uint32(_DROP_THRESH)) & (h > 0.0)
    return jnp.where(keep, h * np.float32(_KEEP_SCALE), np.float32(0.0))


def mlp_kernel(seed_ref,                                           # SMEM (prefetch)
               x_ref, w1_ref, b1_ref, w2_ref, b2_ref, w3_ref, b3_ref,  # VMEM
               o_ref):
    block_b = x_ref.shape[0]
    seed = seed_ref[0].astype(jnp.uint32)
    row0 = (pl.program_id(0) * block_b).astype(jnp.uint32)

    # Per-tile element index, computed once at the widest (128) layer width and
    # reused for both dropout layers.
    rows = lax.broadcasted_iota(jnp.int32, (block_b, 128), 0).astype(jnp.uint32) + row0
    cols = lax.broadcasted_iota(jnp.int32, (block_b, 128), 1).astype(jnp.uint32)
    base = (rows * np.uint32(128) + cols) ^ seed

    # layer1 (10 -> 64): bf16 x bf16 MXU, f32 accumulate, fused relu+dropout.
    h1 = jnp.dot(x_ref[...], w1_ref[...],
                 preferred_element_type=jnp.float32) + b1_ref[...]
    h1 = _relu_dropout(h1, _lowbias32(base[:, :64] + np.uint32(_SALT1)))

    # layer2 (64 -> 128)
    h2 = jnp.dot(h1.astype(jnp.bfloat16), w2_ref[...],
                 preferred_element_type=jnp.float32) + b2_ref[...]
    h2 = _relu_dropout(h2, _lowbias32(base + np.uint32(_SALT2)))

    # layer3 (128 -> 1), emitted lane-dense as a (1, block_b) row on the MXU:
    # z = w3 (1,128) @ h2^T (128,block_b)
    z = lax.dot_general(w3_ref[...], h2.astype(jnp.bfloat16),
                        dimension_numbers=(((1,), (1,)), ((), ())),
                        preferred_element_type=jnp.float32)
    z = z + b3_ref[...]                       # (1,1) broadcasts over (1, block_b)

    # sigmoid via tanh (EUP slot, numerically stable), lane-dense store.
    sig = 0.5 * (jnp.tanh(0.5 * z) + 1.0)
    o_ref[...] = sig.reshape(o_ref.shape).astype(o_ref.dtype)


@functools.partial(jax.jit, static_argnames=("block_b",))
def nn_forward(seed, x, w1, b1, w2, b2, w3, b3, *, block_b=None):
    B, F = x.shape
    if block_b is None:
        # v5e-safe default (16 MiB scoped VMEM). On v6e raise to ~4096 (with
        # vmem_limit_bytes); on v7x keep 2048-4096 with an even >=2 tile grid.
        block_b = min(2048, _round_up(B, 8))
    B_pad = _round_up(B, block_b)
    num_tiles = B_pad // block_b

    # bf16 on the HBM->VMEM / MXU path; elementwise math stays f32 in-kernel.
    x_in = x.astype(jnp.bfloat16)
    if B_pad != B:
        x_in = jnp.pad(x_in, ((0, B_pad - B), (0, 0)))
    w1b = w1.astype(jnp.bfloat16)
    w2b = w2.astype(jnp.bfloat16)
    w3b = w3.reshape(1, 128).astype(jnp.bfloat16)   # row vector for transposed dot
    b1r = b1.reshape(1, 64).astype(jnp.float32)
    b2r = b2.reshape(1, 128).astype(jnp.float32)
    b3r = b3.reshape(1, 1).astype(jnp.float32)

    def resident(shape):   # weights/biases: same block every grid step
        return pl.BlockSpec(shape, lambda i, s: (0,) * len(shape))

    flops = 2 * B_pad * (10 * 64 + 64 * 128 + 128)
    bytes_accessed = (B_pad * F * 2 + B_pad * 4
                      + 10 * 64 * 2 + 64 * 4
                      + 64 * 128 * 2 + 128 * 4
                      + 128 * 2 + 4)

    out = pl.pallas_call(
        mlp_kernel,
        out_shape=jax.ShapeDtypeStruct((num_tiles, 1, block_b), jnp.float32),
        grid_spec=pltpu.PrefetchScalarGridSpec(
            num_scalar_prefetch=1,
            grid=(num_tiles,),
            in_specs=[
                pl.BlockSpec((block_b, F), lambda i, s: (i, 0)),   # x tile
                resident(w1b.shape), resident(b1r.shape),
                resident(w2b.shape), resident(b2r.shape),
                resident(w3b.shape), resident(b3r.shape),
            ],
            out_specs=pl.BlockSpec((1, 1, block_b), lambda i, s: (i, 0, 0)),
        ),
        compiler_params=pltpu.CompilerParams(
            dimension_semantics=("parallel",),
        ),
        cost_estimate=pl.CostEstimate(
            flops=flops, transcendentals=B_pad, bytes_accessed=bytes_accessed),
    )(seed, x_in, w1b, b1r, w2b, b2r, w3b, b3r)

    # lane-dense (num_tiles, 1, block_b) -> (B, 1)
    return out.reshape(B_pad, 1)[:B]


def init_params(key):
    """Deterministic init matching torch.nn.Linear default: U(-1/sqrt(fan_in), +)."""
    def linear(k, fan_in, fan_out):
        kw, kb = jax.random.split(k)
        bound = 1.0 / (fan_in ** 0.5)
        w = jax.random.uniform(kw, (fan_in, fan_out), jnp.float32, -bound, bound)
        b = jax.random.uniform(kb, (1, fan_out), jnp.float32, -bound, bound)
        return w, b

    k1, k2, k3 = jax.random.split(key, 3)
    w1, b1 = linear(k1, 10, 64)
    w2, b2 = linear(k2, 64, 128)
    w3, b3 = linear(k3, 128, 1)
    return w1, b1, w2, b2, w3, b3


if __name__ == "__main__":
    key = jax.random.PRNGKey(0)
    kx, kp = jax.random.split(key)

    B = 8
    x = jax.random.normal(kx, (B, 10), jnp.float32)
    w1, b1, w2, b2, w3, b3 = init_params(kp)
    seed = jnp.array([42], dtype=jnp.int32)

    out = nn_forward(seed, x, w1, b1, w2, b2, w3, b3)
    out = jax.block_until_ready(out)

    assert out.shape == (B, 1)
    assert bool(jnp.all((out >= 0.0) & (out <= 1.0)))
    print("KERNEL_OK")
</pallas_src>

<mosaic_0001>
module attributes {stable_mosaic.version = 11 : i64} {
  func.func @mlp_kernel(%arg0: i32, %arg1: memref<1xi32, #tpu.memory_space<smem>>, %arg2: memref<8x10xbf16, #tpu.memory_space<vmem>>, %arg3: memref<10x64xbf16, #tpu.memory_space<vmem>>, %arg4: memref<1x64xf32, #tpu.memory_space<vmem>>, %arg5: memref<64x128xbf16, #tpu.memory_space<vmem>>, %arg6: memref<1x128xf32, #tpu.memory_space<vmem>>, %arg7: memref<1x128xbf16, #tpu.memory_space<vmem>>, %arg8: memref<1x1xf32, #tpu.memory_space<vmem>>, %arg9: memref<1x1x8xf32, #tpu.memory_space<vmem>>) attributes {dimension_semantics = [#tpu.dimension_semantics<parallel>], iteration_bounds = array<i64: 1>, scalar_prefetch = 1 : i64, scratch_operands = 0 : i64, tpu.core_type = #tpu.core_type<tc>, window_params = [{transform_indices = @transform_0, window_bounds = array<i64: 8, 10>}, {pipeline_mode = #tpu.pipeline_mode<synchronous>, transform_indices = @transform_1, window_bounds = array<i64: 10, 64>}, {pipeline_mode = #tpu.pipeline_mode<synchronous>, transform_indices = @transform_2, window_bounds = array<i64: 1, 64>}, {pipeline_mode = #tpu.pipeline_mode<synchronous>, transform_indices = @transform_3, window_bounds = array<i64: 64, 128>}, {pipeline_mode = #tpu.pipeline_mode<synchronous>, transform_indices = @transform_4, window_bounds = array<i64: 1, 128>}, {pipeline_mode = #tpu.pipeline_mode<synchronous>, transform_indices = @transform_5, window_bounds = array<i64: 1, 128>}, {pipeline_mode = #tpu.pipeline_mode<synchronous>, transform_indices = @transform_6, window_bounds = array<i64: 1, 1>}, {transform_indices = @transform_7, window_bounds = array<i64: 1, 1, 8>}]} {
    %c0 = arith.constant 0 : index
    %0 = memref.load %arg1[%c0] : memref<1xi32, #tpu.memory_space<smem>>
    %c8_i32 = arith.constant 8 : i32
    %1 = arith.muli %arg0, %c8_i32 : i32
    %2 = tpu.iota {dimensions = array<i32: 0>} : vector<8x128xi32>
    %3 = vector.broadcast %1 : i32 to vector<8x128xi32>
    %4 = arith.addi %2, %3 : vector<8x128xi32>
    %5 = tpu.iota {dimensions = array<i32: 1>} : vector<8x128xi32>
    %c128_i32 = arith.constant 128 : i32
    %6 = vector.broadcast %c128_i32 : i32 to vector<8x128xi32>
    %7 = arith.muli %4, %6 : vector<8x128xi32>
    %8 = arith.addi %7, %5 : vector<8x128xi32>
    %9 = vector.broadcast %0 : i32 to vector<8x128xi32>
    %10 = arith.xori %8, %9 : vector<8x128xi32>
    %c0_0 = arith.constant 0 : index
    %c0_1 = arith.constant 0 : index
    %11 = vector.load %arg2[%c0_0, %c0_1] : memref<8x10xbf16, #tpu.memory_space<vmem>>, vector<8x10xbf16>
    %c0_2 = arith.constant 0 : index
    %c0_3 = arith.constant 0 : index
    %12 = vector.load %arg3[%c0_2, %c0_3] : memref<10x64xbf16, #tpu.memory_space<vmem>>, vector<10x64xbf16>
    %cst = arith.constant dense<0.000000e+00> : vector<8x64xf32>
    %13 = tpu.matmul %11, %12, %cst {dimension_numbers = #tpu.dot_dimension_numbers<[1], [0], [0], [1], [0, 0, 1, 1], [], []>} : vector<8x10xbf16>, vector<10x64xbf16>, vector<8x64xf32> -> vector<8x64xf32>
    %c0_4 = arith.constant 0 : index
    %c0_5 = arith.constant 0 : index
    %14 = vector.load %arg4[%c0_4, %c0_5] : memref<1x64xf32, #tpu.memory_space<vmem>>, vector<1x64xf32>
    %15 = vector.broadcast %14 : vector<1x64xf32> to vector<8x64xf32>
    %16 = arith.addf %13, %15 : vector<8x64xf32>
    %17 = vector.extract_strided_slice %10 {offsets = [0, 0], sizes = [8, 64], strides = [1, 1]} : vector<8x128xi32> to vector<8x64xi32>
    %c-1640531527_i32 = arith.constant -1640531527 : i32
    %18 = vector.broadcast %c-1640531527_i32 : i32 to vector<8x64xi32>
    %19 = arith.addi %17, %18 : vector<8x64xi32>
    %c16_i32 = arith.constant 16 : i32
    %20 = vector.broadcast %c16_i32 : i32 to vector<8x64xi32>
    %21 = arith.shrui %19, %20 : vector<8x64xi32>
    %22 = arith.xori %19, %21 : vector<8x64xi32>
    %c2146121005_i32 = arith.constant 2146121005 : i32
    %23 = vector.broadcast %c2146121005_i32 : i32 to vector<8x64xi32>
    %24 = arith.muli %22, %23 : vector<8x64xi32>
    %c15_i32 = arith.constant 15 : i32
    %25 = vector.broadcast %c15_i32 : i32 to vector<8x64xi32>
    %26 = arith.shrui %24, %25 : vector<8x64xi32>
    %27 = arith.xori %24, %26 : vector<8x64xi32>
    %c-2073254261_i32 = arith.constant -2073254261 : i32
    %28 = vector.broadcast %c-2073254261_i32 : i32 to vector<8x64xi32>
    %29 = arith.muli %27, %28 : vector<8x64xi32>
    %c16_i32_6 = arith.constant 16 : i32
    %30 = vector.broadcast %c16_i32_6 : i32 to vector<8x64xi32>
    %31 = arith.shrui %29, %30 : vector<8x64xi32>
    %32 = arith.xori %29, %31 : vector<8x64xi32>
    %c1073741824_i32 = arith.constant 1073741824 : i32
    %33 = vector.broadcast %c1073741824_i32 : i32 to vector<8x64xi32>
    %34 = arith.cmpi uge, %32, %33 : vector<8x64xi32>
    %cst_7 = arith.constant 0.000000e+00 : f32
    %35 = vector.broadcast %cst_7 : f32 to vector<8x64xf32>
    %36 = arith.cmpf ogt, %16, %35 : vector<8x64xf32>
    %37 = arith.andi %34, %36 : vector<8x64xi1>
    %cst_8 = arith.constant 1.33333337 : f32
    %38 = vector.broadcast %cst_8 : f32 to vector<8x64xf32>
    %39 = arith.mulf %16, %38 : vector<8x64xf32>
    %cst_9 = arith.constant 0.000000e+00 : f32
    %40 = vector.broadcast %cst_9 : f32 to vector<8x64xf32>
    %41 = arith.select %37, %39, %40 : vector<8x64xi1>, vector<8x64xf32>
    %42 = arith.truncf %41 : vector<8x64xf32> to vector<8x64xbf16>
    %c0_10 = arith.constant 0 : index
    %c0_11 = arith.constant 0 : index
    %43 = vector.load %arg5[%c0_10, %c0_11] : memref<64x128xbf16, #tpu.memory_space<vmem>>, vector<64x128xbf16>
    %cst_12 = arith.constant dense<0.000000e+00> : vector<8x128xf32>
    %44 = tpu.matmul %42, %43, %cst_12 {dimension_numbers = #tpu.dot_dimension_numbers<[1], [0], [0], [1], [0, 0, 1, 1], [], []>} : vector<8x64xbf16>, vector<64x128xbf16>, vector<8x128xf32> -> vector<8x128xf32>
    %c0_13 = arith.constant 0 : index
    %c0_14 = arith.constant 0 : index
    %45 = vector.load %arg6[%c0_13, %c0_14] : memref<1x128xf32, #tpu.memory_space<vmem>>, vector<1x128xf32>
    %46 = vector.broadcast %45 : vector<1x128xf32> to vector<8x128xf32>
    %47 = arith.addf %44, %46 : vector<8x128xf32>
    %c1013904242_i32 = arith.constant 1013904242 : i32
    %48 = vector.broadcast %c1013904242_i32 : i32 to vector<8x128xi32>
    %49 = arith.addi %10, %48 : vector<8x128xi32>
    %c16_i32_15 = arith.constant 16 : i32
    %50 = vector.broadcast %c16_i32_15 : i32 to vector<8x128xi32>
    %51 = arith.shrui %49, %50 : vector<8x128xi32>
    %52 = arith.xori %49, %51 : vector<8x128xi32>
    %c2146121005_i32_16 = arith.constant 2146121005 : i32
    %53 = vector.broadcast %c2146121005_i32_16 : i32 to vector<8x128xi32>
    %54 = arith.muli %52, %53 : vector<8x128xi32>
    %c15_i32_17 = arith.constant 15 : i32
    %55 = vector.broadcast %c15_i32_17 : i32 to vector<8x128xi32>
    %56 = arith.shrui %54, %55 : vector<8x128xi32>
    %57 = arith.xori %54, %56 : vector<8x128xi32>
    %c-2073254261_i32_18 = arith.constant -2073254261 : i32
    %58 = vector.broadcast %c-2073254261_i32_18 : i32 to vector<8x128xi32>
    %59 = arith.muli %57, %58 : vector<8x128xi32>
    %c16_i32_19 = arith.constant 16 : i32
    %60 = vector.broadcast %c16_i32_19 : i32 to vector<8x128xi32>
    %61 = arith.shrui %59, %60 : vector<8x128xi32>
    %62 = arith.xori %59, %61 : vector<8x128xi32>
    %c1073741824_i32_20 = arith.constant 1073741824 : i32
    %63 = vector.broadcast %c1073741824_i32_20 : i32 to vector<8x128xi32>
    %64 = arith.cmpi uge, %62, %63 : vector<8x128xi32>
    %cst_21 = arith.constant 0.000000e+00 : f32
    %65 = vector.broadcast %cst_21 : f32 to vector<8x128xf32>
    %66 = arith.cmpf ogt, %47, %65 : vector<8x128xf32>
    %67 = arith.andi %64, %66 : vector<8x128xi1>
    %cst_22 = arith.constant 1.33333337 : f32
    %68 = vector.broadcast %cst_22 : f32 to vector<8x128xf32>
    %69 = arith.mulf %47, %68 : vector<8x128xf32>
    %cst_23 = arith.constant 0.000000e+00 : f32
    %70 = vector.broadcast %cst_23 : f32 to vector<8x128xf32>
    %71 = arith.select %67, %69, %70 : vector<8x128xi1>, vector<8x128xf32>
    %c0_24 = arith.constant 0 : index
    %c0_25 = arith.constant 0 : index
    %72 = vector.load %arg7[%c0_24, %c0_25] : memref<1x128xbf16, #tpu.memory_space<vmem>>, vector<1x128xbf16>
    %73 = arith.truncf %71 : vector<8x128xf32> to vector<8x128xbf16>
    %cst_26 = arith.constant dense<0.000000e+00> : vector<1x8xf32>
    %74 = tpu.matmul %72, %73, %cst_26 {dimension_numbers = #tpu.dot_dimension_numbers<[1], [1], [0], [0], [0, 0, 1, 0], [], []>} : vector<1x128xbf16>, vector<8x128xbf16>, vector<1x8xf32> -> vector<1x8xf32>
    %c0_27 = arith.constant 0 : index
    %c0_28 = arith.constant 0 : index
    %75 = vector.load %arg8[%c0_27, %c0_28] : memref<1x1xf32, #tpu.memory_space<vmem>>, vector<1x1xf32>
    %76 = vector.broadcast %75 : vector<1x1xf32> to vector<1x8xf32>
    %77 = arith.addf %74, %76 : vector<1x8xf32>
    %cst_29 = arith.constant 5.000000e-01 : f32
    %78 = vector.broadcast %cst_29 : f32 to vector<1x8xf32>
    %79 = arith.mulf %78, %77 : vector<1x8xf32>
    %80 = math.tanh %79 : vector<1x8xf32>
    %cst_30 = arith.constant 1.000000e+00 : f32
    %81 = vector.broadcast %cst_30 : f32 to vector<1x8xf32>
    %82 = arith.addf %80, %81 : vector<1x8xf32>
    %cst_31 = arith.constant 5.000000e-01 : f32
    %83 = vector.broadcast %cst_31 : f32 to vector<1x8xf32>
    %84 = arith.mulf %83, %82 : vector<1x8xf32>
    %85 = vector.shape_cast %84 : vector<1x8xf32> to vector<1x1x8xf32>
    %c0_32 = arith.constant 0 : index
    %c0_33 = arith.constant 0 : index
    %c0_34 = arith.constant 0 : index
    %86 = vector.load %arg9[%c0_32, %c0_33, %c0_34] : memref<1x1x8xf32, #tpu.memory_space<vmem>>, vector<1x1x8xf32>
    tpu.vector_store %arg9[%c0_32, %c0_33, %c0_34], %85 {strides = array<i32>} : memref<1x1x8xf32, #tpu.memory_space<vmem>>, vector<1x1x8xf32>,
    return
  }
  func.func @transform_0(%arg0: i32, %arg1: memref<1xi32, #tpu.memory_space<smem>>) -> (i32, i32) {
    %c0_i32 = arith.constant 0 : i32
    %c0_i32_0 = arith.constant 0 : i32
    return %arg0, %c0_i32 : i32, i32
  }
  func.func @transform_1(%arg0: i32, %arg1: memref<1xi32, #tpu.memory_space<smem>>) -> (i32, i32) {
    %c0_i32 = arith.constant 0 : i32
    %c0_i32_0 = arith.constant 0 : i32
    %c0_i32_1 = arith.constant 0 : i32
    return %c0_i32, %c0_i32_0 : i32, i32
  }
  func.func @transform_2(%arg0: i32, %arg1: memref<1xi32, #tpu.memory_space<smem>>) -> (i32, i32) {
    %c0_i32 = arith.constant 0 : i32
    %c0_i32_0 = arith.constant 0 : i32
    %c0_i32_1 = arith.constant 0 : i32
    return %c0_i32, %c0_i32_0 : i32, i32
  }
  func.func @transform_3(%arg0: i32, %arg1: memref<1xi32, #tpu.memory_space<smem>>) -> (i32, i32) {
    %c0_i32 = arith.constant 0 : i32
    %c0_i32_0 = arith.constant 0 : i32
    %c0_i32_1 = arith.constant 0 : i32
    return %c0_i32, %c0_i32_0 : i32, i32
  }
  func.func @transform_4(%arg0: i32, %arg1: memref<1xi32, #tpu.memory_space<smem>>) -> (i32, i32) {
    %c0_i32 = arith.constant 0 : i32
    %c0_i32_0 = arith.constant 0 : i32
    %c0_i32_1 = arith.constant 0 : i32
    return %c0_i32, %c0_i32_0 : i32, i32
  }
  func.func @transform_5(%arg0: i32, %arg1: memref<1xi32, #tpu.memory_space<smem>>) -> (i32, i32) {
    %c0_i32 = arith.constant 0 : i32
    %c0_i32_0 = arith.constant 0 : i32
    %c0_i32_1 = arith.constant 0 : i32
    return %c0_i32, %c0_i32_0 : i32, i32
  }
  func.func @transform_6(%arg0: i32, %arg1: memref<1xi32, #tpu.memory_space<smem>>) -> (i32, i32) {
    %c0_i32 = arith.constant 0 : i32
    %c0_i32_0 = arith.constant 0 : i32
    %c0_i32_1 = arith.constant 0 : i32
    return %c0_i32, %c0_i32_0 : i32, i32
  }
  func.func @transform_7(%arg0: i32, %arg1: memref<1xi32, #tpu.memory_space<smem>>) -> (i32, i32, i32) {
    %c0_i32 = arith.constant 0 : i32
    %c0_i32_0 = arith.constant 0 : i32
    %c0_i32_1 = arith.constant 0 : i32
    return %arg0, %c0_i32, %c0_i32_0 : i32, i32, i32
  }
}

</mosaic_0001>

<bundles_post_ra>
// kernel: nn_forward.1
= control target key start
LH: loop header
LB: loop body
LE: loop exit
PB: predicated region body
PF: predicated region fallthrough
CT: control target
= control target key end

     0   :  { %s466_s0 = inlined_call_operand.<no memory space> [shape: s32[1], index: 0, kind: input, shape index: {}]   ;;  %s467_s1 = inlined_call_operand.vmem [shape: bf16[8,10], index: 1, kind: input, shape index: {}]   ;;  %s468_s2 = inlined_call_operand.vmem [shape: bf16[10,64], index: 2, kind: input, shape index: {}]   ;;  %s469_s3 = inlined_call_operand.vmem [shape: f32[1,64], index: 3, kind: input, shape index: {}]   ;;  %s470_s4 = inlined_call_operand.vmem [shape: bf16[64,128], index: 4, kind: input, shape index: {}]   ;;  %s471_s5 = inlined_call_operand.vmem [shape: f32[1,128], index: 5, kind: input, shape index: {}]   ;;  %s472_s6 = inlined_call_operand.vmem [shape: bf16[1,128], index: 6, kind: input, shape index: {}]   ;;  %s473_s7 = inlined_call_operand.<no memory space> [shape: f32[1,1], index: 7, kind: input, shape index: {}]   ;;  %s474_s8 = inlined_call_operand.hbm [shape: f32[1,1,8], index: 8, kind: output, shape index: {}]  }
   0x1   :  { %v14_v0 = vstv %s473_s7 }
   0x2   :  { %15 = vst [vmem:[#allocation4] sm:$0x1] %v14_v0 }
   0x3   :  { %vm63_vm0 = vcmask 1044480   ;;  %v372_v1 = vmov 0.0   ;;  %v341_v2 = vld [vmem:[%s468_s2] sm:$0x1f]   ;;  %vm373_vm1 = vmmov 0   ;;  %vm59_vm2 = vcmask 80896  }
   0x4   :  { %312 = vmatprep.subr.bf16.mxu0 %v372_v1  ;;  %318 = vmatprep.subr.bf16.mxu1 %v372_v1  ;;  %v342_v3 = vld [vmem:[%s470_s4] sm:$0xff]   ;;  %v65_v4 = vsel %vm63_vm0, %v341_v2, 0  ;;  %v343_v6 = vld [vmem:[%s470_s4 + $0x8] sm:$0xff]  }
   0x5   :  { %314 = vmatprep.mubr.msk.bf16.mxu0 %vm373_vm1, %v372_v1  ;;  %326 = vmatprep.mubr.msk.bf16.mxu1 %vm373_vm1, %v372_v1  ;;  %v44_v5 = vld [vmem:[%s467_s1] sm:$0xf] }
   0x6   :  { %313 = vmatpush3.bf16.msra.mxu0 %v65_v4  ;;  %319 = vmatpush3.bf16.msra.mxu1 %v342_v3 }
   0x7   :  { %320 = vmatprep.subr.bf16.mxu1 %v372_v1  ;;  %330 = vmatprep.subr.bf16.mxu0 %v372_v1 }
   0x8   :  { %16 = vsyncpa [#allocation6], 0  ;;  %v344_v7 = vld [vmem:[%s470_s4 + $0x10] sm:$0xff]   ;;  %v345_v8 = vld [vmem:[%s470_s4 + $0x18] sm:$0xff]   ;;  %v34_v9 = vlaneseq  ;;  %v42_v14 = vstv %s466_s0  ;;  %vm161_vm6 = vcmask 523264   ;;  %v374_v35 = vmov 0  }
   0x9   :  { %315 = vmatmul.mubr.msk.bf16.vlgmr.msra.gmra.mrb[0].mxu0 %vm59_vm2, %v44_v5  ;;  %v291_v25 = vld [vmem:[%s469_s3] ss:$0 sm:$0xff]  ;;  %340 = vset.pattern.permute.xlu0 %v374_v35  ;;  %vm275_vm11 = vcmask 57344  }
   0xa   :  { %321 = vmatpush3.bf16.msra.mxu1 %v343_v6  ;;  %332 = vmatprep.mubr.msk.bf16.mxu0 %vm373_vm1, %v372_v1  ;;  %v35_v10 = vshrl.u32 %v34_v9, 7  ;;  %v39_v11 = vand.u32 127, %v34_v9  ;;  %v221_v34 = vld [vmem:[#allocation4] sm:$0x1] }
   0xb   :  { %322 = vmatprep.subr.bf16.mxu1 %v372_v1  ;;  %224 = vperm.xlu0 %340, %v221_v34   ;;  %v294_v45 = vld [vmem:[%s471_s5] ss:$0 sm:$0xff]  ;;  %s375_s5 = smov [#allocation5]  }
   0xc   :  { %v40_v12 = vmul.u32 128, %v35_v10  ;;  %v219_v53 = vld [vmem:[%s472_s6] sm:$0x1]  ;;  %v229_v54 = vsub.s32 0, %v35_v10  ;;  %s283_s21 = sshll.u32 %s375_s5, 4  ;;  %s284_s21 = int_to_ptr.vmem [resolvable:$true] %s283_s21 }
   0xd   :  { %s348_s6 = scalar_lea.vmem %s284_s21, 16  ;;  %s352_s22 = scalar_lea.vmem %s284_s21, 32 }
   0xe   :  { %323 = vmatpush3.bf16.msra.mxu1 %v344_v7  ;;  %v41_v13 = vadd.s32 %v40_v12, %v39_v11  ;;  %p349_p0 = scmp.ne.s32.totalorder %s284_s21, %s348_s6  ;;  %p353_p1 = scmp.lt.s32.totalorder %s284_s21, %s284_s21 }
   0xf   :  { %324 = vmatprep.subr.bf16.mxu1 %v372_v1  ;;  %p354_p2 = scmp.lt.s32.totalorder %s352_s22, %s348_s6 }
  0x10   :  { %v43_v15 = vxor.u32 %v42_v14, %v41_v13 }
  0x11   :  { %p355_p3 = por %p354_p2, %p353_p1 }
  0x12   :  { %325 = vmatpush3.bf16.msra.mxu1 %v345_v8  ;;  %v107_v16 = vadd.s32 2654435769, %v43_v15  ;;  %v205_v36 = vadd.s32 1013904242, %v43_v15 }
  0x13   :  { %p356_p4 = pnand %p355_p3, %p349_p0 }
  0x14   :  { %v108_v17 = vshrl.u32 %v107_v16, 16  ;;  %v206_v37 = vshrl.u32 %v205_v36, 16 }
  0x16   :  { %v109_v18 = vxor.u32 %v108_v17, %v107_v16  ;;  %v207_v38 = vxor.u32 %v206_v37, %v205_v36 }
  0x18   :  { %v110_v19 = vmul.u32 2146121005, %v109_v18  ;;  %v208_v39 = vmul.u32 2146121005, %v207_v38 }
  0x1a   :  { %v111_v20 = vshrl.u32 %v110_v19, 15  ;;  %v209_v40 = vshrl.u32 %v208_v39, 15 }
  0x1c   :  { %v112_v21 = vxor.u32 %v111_v20, %v110_v19  ;;  %v210_v41 = vxor.u32 %v209_v40, %v208_v39 }
  0x1e   :  { %v113_v22 = vmul.u32 2221713035, %v112_v21  ;;  %v211_v42 = vmul.u32 2221713035, %v210_v41 }
  0x20   :  { %v114_v23 = vshrl.u32 %v113_v22, 16  ;;  %v212_v43 = vshrl.u32 %v211_v42, 16 }
  0x22   :  { %v115_v24 = vxor.u32 %v114_v23, %v113_v22  ;;  %v213_v44 = vxor.u32 %v212_v43, %v211_v42 }
  0x24   :  { %vm116_vm3 = vcmp.ge.u32.totalorder %v115_v24, 1073741824  ;;  %vm214_vm7 = vcmp.ge.u32.totalorder %v213_v44, 1073741824 }
  0x8a   :  { %v225_v55 = vpop.permute.xlu0 %224 }
  0x8b   :  { %v230_v56 = vrot.slane %v225_v55, %v229_v54 }
  0xdc   :  { %v101_v26 = vpop.f32.mrb[0].mxu0 }
  0xdd   :  { %v102_v27 = vadd.f32 %v291_v25, %v101_v26  ;;  %v316_v28 = vpop.f32.mrb[1].mxu0 }
  0xde   :  { %v104_v29 = vpop.f32.mrb[2].mxu0 }
  0xdf   :  { %vm117_vm4 = vcmp.gt.f32.partialorder %v102_v27, 0.0  ;;  %v119_v30 = vmul.f32 1.3333334, %v102_v27  ;;  %v317_v31 = vpop.f32.mrb[3].mxu0 }
  0xe0   :  { %vm118_vm5 = vmand %vm116_vm3, %vm117_vm4 }
  0xe1   :  { %v120_v32 = vsel %vm118_vm5, %v119_v30, 0.0 }
  0xe2   :  { %v121_v33 = vpack.c.bf16 %v120_v32, %v120_v32 }
  0xe4   :  { %327 = vmatmul.mubr.msk.bf16.vlgmr.msra.gmra.mrb[0].mxu1 %vm161_vm6, %v121_v33 }
 0x1b7   :  { %v199_v46 = vpop.f32.mrb[0].mxu1 }
 0x1b8   :  { %v200_v47 = vadd.f32 %v294_v45, %v199_v46  ;;  %v328_v48 = vpop.f32.mrb[1].mxu1 }
 0x1b9   :  { %v202_v49 = vpop.f32.mrb[2].mxu1 }
 0x1ba   :  { %vm215_vm8 = vcmp.gt.f32.partialorder %v200_v47, 0.0  ;;  %v217_v50 = vmul.f32 1.3333334, %v200_v47  ;;  %v329_v51 = vpop.f32.mrb[3].mxu1 }
 0x1bb   :  { %vm216_vm9 = vmand %vm214_vm7, %vm215_vm8 }
 0x1bc   :  { %vm300_vm10 = vmpackc.low %vm216_vm9, %vm216_vm9  ;;  %v301_v52 = vpack.c.bf16 %v217_v50, %v217_v50 }
 0x1be   :  { %331 = vmatpush3.bf16.xpose.msk.msra.mxu0 %vm300_vm10, %v301_v52 }
 0x1c5   :  { %333 = vmatmul.mubr.bf16.vlgmr.msra.gmra.mrb[4].mxu0 %v219_v53 }
 0x298   :  { %v265_v57 = vpop.f32.mrb[4].mxu0 }
 0x299   :  { %v266_v58 = vadd.f32 %v265_v57, %v230_v56  ;;  %v334_v59 = vpop.f32.mrb[5].mxu0 }
 0x29a   :  { %v268_v60 = vpop.f32.mrb[6].mxu0 }
 0x29b   :  { %v271_v61 = vmul.f32 0.5, %v266_v58  ;;  %v335_v62 = vpop.f32.mrb[7].mxu0 }
 0x29d   :  { %346 = vtanh.f32 %v271_v61 }
 0x2a7   :  { %v347_v63 = vpop.eup %346 }
 0x2a8   :  { %v273_v0 = vadd.f32 1.0, %v347_v63 }
 0x2aa   :  { %v274_v1 = vmul.f32 0.5, %v273_v0 }
 0x2ac   :  { %276 = vst.msk [vmem:[#allocation5] sm:$0x1] %vm275_vm11, %v274_v1 }
 0x2ad   :  { %359 = shalt.err (!%p356_p4)
}
 0x2ae   :  { %s360_s25 = scalar_lea.hbm %s474_s8, 16 }
 0x2af   :  { %p361_p5 = scmp.ne.s32.totalorder %s474_s8, %s360_s25  ;;  %p364_p6 = scmp.lt.u32.totalorder %s360_s25, %s474_s8 }
 0x2b1   :  { %p366_p7 = pnand %p364_p6, %p361_p5 }
 0x2b3   :  { %369 = shalt.err (!%p366_p7)
}
 0x2b4   :  { %286 = dma.vmem_to_hbm [thread:$0]  %s284_s21, 16, %s474_s8, [#allocation6]  }
 0x2b5   :  { %370 = dma.done.wait [#allocation6], 16  }
 0x2b6   :  { %371 = vsyncadd [#allocation6], 4294967280 }
 0x2b7   :  { %290 = vsyncpa [#allocation6], 1 }

</bundles_post_ra>
